<compile_context>
chip_gen: v7x
topology: tpu7x:2x2x1
jax: 0.10.0
libtpu: 0.0.40
codegen_flags: <defaults>
</compile_context>

<pallas_src>
import jax
import jax.numpy as jnp
from jax.experimental import pallas as pl
from jax.experimental.pallas import tpu as pltpu

_MIB = 1024 * 1024


def _round_up(x, m):
    return (x + m - 1) // m * m


def vqa_kernel(cnn_ref, bert_ref, w1c_ref, w1b_ref, b1_ref, w2_ref, b2_ref, out_ref):
    # fc1 without the concat: two bf16 MXU pushes over the pre-split W1 with f32
    # accumulation, then bias + ReLU on the VPU in f32.
    h = jnp.dot(cnn_ref[...], w1c_ref[...], preferred_element_type=jnp.float32)
    h = h + jnp.dot(bert_ref[...], w1b_ref[...], preferred_element_type=jnp.float32)
    h = jnp.maximum(h + b1_ref[...], 0.0)

    # fc2: bf16 MXU matmul with f32 accumulation, bias in f32.
    y = jnp.dot(h.astype(jnp.bfloat16), w2_ref[...], preferred_element_type=jnp.float32)
    out_ref[...] = y + b2_ref[...]


def vqa_forward(cnn_features, bert_features, params):
    """Full VQAModel forward in a single Pallas kernel, gridded over batch with
    weights resident (single-buffered) in VMEM across grid steps."""
    w1, b1, w2, b2 = params
    B, Fc = cnn_features.shape
    Fb = bert_features.shape[1]
    K, H = w1.shape
    C = w2.shape[1]
    assert K == Fc + Fb, "W1 fan-in must equal Fc + Fb"

    # --- lane-dense class dimension: pad C to a multiple of 128 ---------------
    Cp = _round_up(C, 128)
    if Cp != C:
        w2 = jnp.pad(w2, ((0, 0), (0, Cp - C)))
        b2 = jnp.pad(b2, ((0, 0), (0, Cp - C)))

    # --- split W1 so the concat never materializes ----------------------------
    w1c = w1[:Fc, :]
    w1b = w1[Fc:, :]

    # --- stream activations as bf16 (cast here so it can fuse upstream) -------
    cnn_features = cnn_features.astype(jnp.bfloat16)
    bert_features = bert_features.astype(jnp.bfloat16)

    # --- batch tiling ----------------------------------------------------------
    if B <= 256:
        # 2-way split so the "parallel" axis can shard across v7x's two TCs.
        tb = max(8, _round_up(pl.cdiv(B, 2), 8))
        Bp = 2 * tb
    else:
        # 256-multiple tile: fills the 256-row MXU, amortizes per-step overhead,
        # and (double-buffered) still fits v7x's 64 MiB VMEM at ~3k classes.
        tb = 512
        Bp = _round_up(B, tb)
    if Bp != B:
        pad = Bp - B
        cnn_features = jnp.pad(cnn_features, ((0, pad), (0, 0)))
        bert_features = jnp.pad(bert_features, ((0, pad), (0, 0)))

    grid = (Bp // tb,)

    # --- VMEM budget (activations double-buffered, weights single-buffered) ---
    vmem_bytes = (
        2 * tb * (Fc + Fb) * 2      # double-buffered bf16 input blocks
        + (K * H + H * Cp) * 2      # single-buffered bf16 weights
        + (H + Cp) * 4              # f32 biases
        + 2 * tb * Cp * 4           # double-buffered f32 output blocks
    )
    vmem_limit = min(64 * _MIB, max(32 * _MIB, int(1.5 * vmem_bytes) + 8 * _MIB))

    flops = 2 * Bp * H * (K + Cp)
    bytes_accessed = (
        Bp * (Fc + Fb) * 2          # bf16 activations in
        + (K * H + H * Cp) * 2      # bf16 weights (fetched once)
        + (H + Cp) * 4              # f32 biases
        + Bp * Cp * 4               # f32 logits out
    )

    resident = dict(pipeline_mode=pl.Buffered(1))  # fetched once, one buffer

    out = pl.pallas_call(
        vqa_kernel,
        out_shape=jax.ShapeDtypeStruct((Bp, Cp), jnp.float32),
        grid_spec=pltpu.PrefetchScalarGridSpec(
            num_scalar_prefetch=0,
            grid=grid,
            in_specs=[
                pl.BlockSpec((tb, Fc), lambda i: (i, 0)),              # cnn feats
                pl.BlockSpec((tb, Fb), lambda i: (i, 0)),              # bert feats
                pl.BlockSpec((Fc, H), lambda i: (0, 0), **resident),   # W1[:Fc]
                pl.BlockSpec((Fb, H), lambda i: (0, 0), **resident),   # W1[Fc:]
                pl.BlockSpec((1, H), lambda i: (0, 0), **resident),    # b1
                pl.BlockSpec((H, Cp), lambda i: (0, 0), **resident),   # W2
                pl.BlockSpec((1, Cp), lambda i: (0, 0), **resident),   # b2
            ],
            out_specs=pl.BlockSpec((tb, Cp), lambda i: (i, 0)),
        ),
        compiler_params=pltpu.CompilerParams(
            dimension_semantics=("parallel",),
            vmem_limit_bytes=vmem_limit,
        ),
        cost_estimate=pl.CostEstimate(
            flops=flops, transcendentals=0, bytes_accessed=bytes_accessed
        ),
    )(cnn_features, bert_features, w1c, w1b, b1, w2, b2)

    return out[:B, :C]


def init_params(key, cnn_feature_size, bert_feature_size, hidden, num_classes):
    """Deterministic init matching nn.Linear's U(-1/sqrt(fan_in), 1/sqrt(fan_in)).
    Weights are stored pre-transposed as (in, out) in bf16; biases stay f32."""
    in1 = cnn_feature_size + bert_feature_size
    k1, k2, k3, k4 = jax.random.split(key, 4)
    bound1 = 1.0 / jnp.sqrt(in1)
    bound2 = 1.0 / jnp.sqrt(hidden)
    w1 = jax.random.uniform(k1, (in1, hidden), jnp.float32, -bound1, bound1)
    b1 = jax.random.uniform(k2, (1, hidden), jnp.float32, -bound1, bound1)
    w2 = jax.random.uniform(k3, (hidden, num_classes), jnp.float32, -bound2, bound2)
    b2 = jax.random.uniform(k4, (1, num_classes), jnp.float32, -bound2, bound2)
    return w1.astype(jnp.bfloat16), b1, w2.astype(jnp.bfloat16), b2


def reference_forward(cnn_features, bert_features, params):
    """Pure-JAX f32 reference mirroring the PyTorch forward (same bf16 params,
    promoted to f32 so only the kernel's bf16 activation rounding differs)."""
    w1, b1, w2, b2 = params
    x = jnp.concatenate([cnn_features, bert_features], axis=1)
    h = jnp.maximum(x @ w1.astype(jnp.float32) + b1, 0.0)
    return h @ w2.astype(jnp.float32) + b2


if __name__ == "__main__":
    # Small, module-consistent sizes (constructor args are configurable;
    # fc1's output is fixed at 512 by the module definition). NUM_CLASSES is
    # deliberately not a multiple of 128 to exercise the lane-padding path.
    B = 8
    CNN_F = 256
    BERT_F = 128
    HIDDEN = 512
    NUM_CLASSES = 100

    key = jax.random.PRNGKey(0)
    k_params, k_cnn, k_bert = jax.random.split(key, 3)

    params = init_params(k_params, CNN_F, BERT_F, HIDDEN, NUM_CLASSES)
    cnn_features = jax.random.normal(k_cnn, (B, CNN_F), jnp.float32)
    bert_features = jax.random.normal(k_bert, (B, BERT_F), jnp.float32)

    out = vqa_forward(cnn_features, bert_features, params)
    out = jax.block_until_ready(out)

    ref = reference_forward(cnn_features, bert_features, params)
    assert out.shape == (B, NUM_CLASSES)
    # bf16 activation rounding inside the kernel -> slightly looser tolerance.
    assert jnp.allclose(out, ref, atol=5e-2, rtol=5e-2), "Pallas kernel mismatch vs reference"

    print("KERNEL_OK")
</pallas_src>

<mosaic_0001>
module attributes {stable_mosaic.version = 11 : i64} {
  func.func @vqa_kernel(%arg0: i32, %arg1: memref<8x256xbf16, #tpu.memory_space<vmem>>, %arg2: memref<8x128xbf16, #tpu.memory_space<vmem>>, %arg3: memref<256x512xbf16, #tpu.memory_space<vmem>>, %arg4: memref<128x512xbf16, #tpu.memory_space<vmem>>, %arg5: memref<1x512xf32, #tpu.memory_space<vmem>>, %arg6: memref<512x128xbf16, #tpu.memory_space<vmem>>, %arg7: memref<1x128xf32, #tpu.memory_space<vmem>>, %arg8: memref<8x128xf32, #tpu.memory_space<vmem>>) attributes {dimension_semantics = [#tpu.dimension_semantics<parallel>], iteration_bounds = array<i64: 2>, scalar_prefetch = 0 : i64, scratch_operands = 0 : i64, tpu.core_type = #tpu.core_type<tc>, window_params = [{transform_indices = @transform_0, window_bounds = array<i64: 8, 256>}, {transform_indices = @transform_1, window_bounds = array<i64: 8, 128>}, {pipeline_mode = #tpu.pipeline_mode<synchronous>, transform_indices = @transform_2, window_bounds = array<i64: 256, 512>}, {pipeline_mode = #tpu.pipeline_mode<synchronous>, transform_indices = @transform_3, window_bounds = array<i64: 128, 512>}, {pipeline_mode = #tpu.pipeline_mode<synchronous>, transform_indices = @transform_4, window_bounds = array<i64: 1, 512>}, {pipeline_mode = #tpu.pipeline_mode<synchronous>, transform_indices = @transform_5, window_bounds = array<i64: 512, 128>}, {pipeline_mode = #tpu.pipeline_mode<synchronous>, transform_indices = @transform_6, window_bounds = array<i64: 1, 128>}, {transform_indices = @transform_7, window_bounds = array<i64: 8, 128>}]} {
    %c0 = arith.constant 0 : index
    %c0_0 = arith.constant 0 : index
    %0 = vector.load %arg1[%c0, %c0_0] : memref<8x256xbf16, #tpu.memory_space<vmem>>, vector<8x256xbf16>
    %c0_1 = arith.constant 0 : index
    %c0_2 = arith.constant 0 : index
    %1 = vector.load %arg3[%c0_1, %c0_2] : memref<256x512xbf16, #tpu.memory_space<vmem>>, vector<256x512xbf16>
    %cst = arith.constant dense<0.000000e+00> : vector<8x512xf32>
    %2 = tpu.matmul %0, %1, %cst {dimension_numbers = #tpu.dot_dimension_numbers<[1], [0], [0], [1], [0, 0, 1, 1], [], []>} : vector<8x256xbf16>, vector<256x512xbf16>, vector<8x512xf32> -> vector<8x512xf32>
    %c0_3 = arith.constant 0 : index
    %c0_4 = arith.constant 0 : index
    %3 = vector.load %arg2[%c0_3, %c0_4] : memref<8x128xbf16, #tpu.memory_space<vmem>>, vector<8x128xbf16>
    %c0_5 = arith.constant 0 : index
    %c0_6 = arith.constant 0 : index
    %4 = vector.load %arg4[%c0_5, %c0_6] : memref<128x512xbf16, #tpu.memory_space<vmem>>, vector<128x512xbf16>
    %cst_7 = arith.constant dense<0.000000e+00> : vector<8x512xf32>
    %5 = tpu.matmul %3, %4, %cst_7 {dimension_numbers = #tpu.dot_dimension_numbers<[1], [0], [0], [1], [0, 0, 1, 1], [], []>} : vector<8x128xbf16>, vector<128x512xbf16>, vector<8x512xf32> -> vector<8x512xf32>
    %6 = arith.addf %2, %5 : vector<8x512xf32>
    %c0_8 = arith.constant 0 : index
    %c0_9 = arith.constant 0 : index
    %7 = vector.load %arg5[%c0_8, %c0_9] : memref<1x512xf32, #tpu.memory_space<vmem>>, vector<1x512xf32>
    %8 = vector.broadcast %7 : vector<1x512xf32> to vector<8x512xf32>
    %9 = arith.addf %6, %8 : vector<8x512xf32>
    %cst_10 = arith.constant 0.000000e+00 : f32
    %10 = vector.broadcast %cst_10 : f32 to vector<8x512xf32>
    %11 = arith.maximumf %9, %10 : vector<8x512xf32>
    %12 = arith.truncf %11 : vector<8x512xf32> to vector<8x512xbf16>
    %c0_11 = arith.constant 0 : index
    %c0_12 = arith.constant 0 : index
    %13 = vector.load %arg6[%c0_11, %c0_12] : memref<512x128xbf16, #tpu.memory_space<vmem>>, vector<512x128xbf16>
    %cst_13 = arith.constant dense<0.000000e+00> : vector<8x128xf32>
    %14 = tpu.matmul %12, %13, %cst_13 {dimension_numbers = #tpu.dot_dimension_numbers<[1], [0], [0], [1], [0, 0, 1, 1], [], []>} : vector<8x512xbf16>, vector<512x128xbf16>, vector<8x128xf32> -> vector<8x128xf32>
    %c0_14 = arith.constant 0 : index
    %c0_15 = arith.constant 0 : index
    %15 = vector.load %arg7[%c0_14, %c0_15] : memref<1x128xf32, #tpu.memory_space<vmem>>, vector<1x128xf32>
    %16 = vector.broadcast %15 : vector<1x128xf32> to vector<8x128xf32>
    %17 = arith.addf %14, %16 : vector<8x128xf32>
    %c0_16 = arith.constant 0 : index
    %c0_17 = arith.constant 0 : index
    %18 = vector.load %arg8[%c0_16, %c0_17] : memref<8x128xf32, #tpu.memory_space<vmem>>, vector<8x128xf32>
    tpu.vector_store %arg8[%c0_16, %c0_17], %17 {strides = array<i32>} : memref<8x128xf32, #tpu.memory_space<vmem>>, vector<8x128xf32>,
    return
  }
  func.func @transform_0(%arg0: i32) -> (i32, i32) {
    %c0_i32 = arith.constant 0 : i32
    %c0_i32_0 = arith.constant 0 : i32
    return %arg0, %c0_i32 : i32, i32
  }
  func.func @transform_1(%arg0: i32) -> (i32, i32) {
    %c0_i32 = arith.constant 0 : i32
    %c0_i32_0 = arith.constant 0 : i32
    return %arg0, %c0_i32 : i32, i32
  }
  func.func @transform_2(%arg0: i32) -> (i32, i32) {
    %c0_i32 = arith.constant 0 : i32
    %c0_i32_0 = arith.constant 0 : i32
    %c0_i32_1 = arith.constant 0 : i32
    return %c0_i32, %c0_i32_0 : i32, i32
  }
  func.func @transform_3(%arg0: i32) -> (i32, i32) {
    %c0_i32 = arith.constant 0 : i32
    %c0_i32_0 = arith.constant 0 : i32
    %c0_i32_1 = arith.constant 0 : i32
    return %c0_i32, %c0_i32_0 : i32, i32
  }
  func.func @transform_4(%arg0: i32) -> (i32, i32) {
    %c0_i32 = arith.constant 0 : i32
    %c0_i32_0 = arith.constant 0 : i32
    %c0_i32_1 = arith.constant 0 : i32
    return %c0_i32, %c0_i32_0 : i32, i32
  }
  func.func @transform_5(%arg0: i32) -> (i32, i32) {
    %c0_i32 = arith.constant 0 : i32
    %c0_i32_0 = arith.constant 0 : i32
    %c0_i32_1 = arith.constant 0 : i32
    return %c0_i32, %c0_i32_0 : i32, i32
  }
  func.func @transform_6(%arg0: i32) -> (i32, i32) {
    %c0_i32 = arith.constant 0 : i32
    %c0_i32_0 = arith.constant 0 : i32
    %c0_i32_1 = arith.constant 0 : i32
    return %c0_i32, %c0_i32_0 : i32, i32
  }
  func.func @transform_7(%arg0: i32) -> (i32, i32) {
    %c0_i32 = arith.constant 0 : i32
    %c0_i32_0 = arith.constant 0 : i32
    return %arg0, %c0_i32 : i32, i32
  }
}

</mosaic_0001>

<bundles_post_ra>
// kernel: tpu_custom_call.1
= control target key start
LH: loop header
LB: loop body
LE: loop exit
PB: predicated region body
PF: predicated region fallthrough
CT: control target
= control target key end

     0   :  { %s2685_s0 = inlined_call_operand.hbm [shape: bf16[16,256], index: 0, kind: input, shape index: {}]   ;;  %s2686_s1 = inlined_call_operand.hbm [shape: bf16[16,128], index: 1, kind: input, shape index: {}]   ;;  %s2687_s2 = inlined_call_operand.hbm [shape: bf16[256,512], index: 2, kind: input, shape index: {}]   ;;  %s2688_s3 = inlined_call_operand.hbm [shape: bf16[128,512], index: 3, kind: input, shape index: {}]   ;;  %s2689_s4 = inlined_call_operand.vmem [shape: f32[1,512], index: 4, kind: input, shape index: {}]   ;;  %s2690_s5 = inlined_call_operand.hbm [shape: bf16[512,128], index: 5, kind: input, shape index: {}]   ;;  %s2691_s6 = inlined_call_operand.vmem [shape: f32[1,128], index: 6, kind: input, shape index: {}]   ;;  %s2692_s7 = inlined_call_operand.hbm [shape: f32[16,128], index: 7, kind: output, shape index: {}]  }
   0x1   :  { %2698 = sst [smem:[#allocation18_spill]] %s2685_s0 }
   0x2   :  { %2699 = sst [smem:[#allocation19_spill]] %s2687_s2 }
   0x3   :  { %12 = vsyncpa [#allocation3], 0 }
   0x4   :  { %14 = vsyncpa [#allocation3 + $0x1], 0 }
   0x5   :  { %15 = vsyncpa [#allocation6], 0 }
   0x6   :  { %17 = vsyncpa [#allocation6 + $0x1], 0 }
   0x7   :  { %18 = vsyncpa [#allocation9], 0 }
   0x8   :  { %19 = vsyncpa [#allocation4], 0 }
   0x9   :  { %21 = vsyncpa [#allocation4 + $0x1], 0  ;;  %s2376_s24 = smov 0   ;;  %s2378_s25 = smov 0  }
   0xa   :  { %s2380_s26 = smov 0   ;;  %s2382_s27 = smov 0  }
   0xb LB: > { %s2397_s28 = sadd.s32 4294967295, %s2323_s27   ;;  %s1638_s29 = sadd.s32 4294967294, %s2323_s27   ;;  %s2323_s27 = sphi %s2382_s27, %s2725_s27   ;;  %s2319_s26 = sphi %s2380_s26, %s2724_s26   ;;  %s2315_s25 = sphi %s2378_s25, %s2723_s25   ;;  %s2311_s24 = sphi %s2376_s24, %s2722_s24  }
   0xc   : > { %p47_p0 = scmp.ne.s32.totalorder %s2315_s25, %s2311_s24  ;;  %p2693_p1 = scmp.eq.s32.totalorder %s2397_s28, 0 }
   0xd   : > { %p208_p3 = scmp.eq.s32.totalorder %s1638_s29, 1  ;;  %p1639_p5 = scmp.ge.s32.totalorder %s2323_s27, 1 }
   0xe   : > { %p2406_p4 = por %p2693_p1, %p47_p0  ;;  %p215_p7 = scmp.lt.s32.totalorder %s2323_s27, 3 }
   0xf   : > { %p2411_p6 = por %p208_p3, %p47_p0  ;;  %s2325_s10 = smov [#allocation7]  }
  0x10   : > { %s2700_s30 = scalar_select %p2406_p4, 1, 0 }
  0x11   : > { %s2701_s8 = scalar_select %p2411_p6, 1, 0 }
  0x12   : > { %p2416_p8 = pnand %p1639_p5, %p215_p7  ;;  %s227_s11 = sshll.u32 %s2325_s10, 4  ;;  %s2420_s11 = int_to_ptr.vmem [resolvable:$true] %s227_s11 }
  0x13   : > { %2702 = sst [smem:[#allocation17_spill]] %s2701_s8  ;;  %s2326_s13 = smov [#allocation8]  }
  0x14   : > { %s2703_s9 = scalar_select %p2416_p8, 1, 0 }
  0x15   : > { %p1854_p9 = pneg %p2416_p8  ;;  %s240_s14 = sshll.u32 %s2326_s13, 4  ;;  %s2431_s14 = int_to_ptr.vmem [resolvable:$true] %s240_s14 }
  0x16   : > { %s2327_s15 = smov [#allocation10]   ;;  %s2705_s2 = sld [smem:[#allocation19_spill]] }
  0x17   : > { %p2427_p11 = pnand %p1854_p9, %p2693_p1  ;;  %s2433_s16 = sshll.u32 %s2327_s15, 4  ;;  %s257_s16 = int_to_ptr.vmem [resolvable:$true] %s2433_s16 }
  0x19   : > { %p2443_p13 = pneg %p2427_p11 }
  0x1c   : > { %s2101_s19 = scalar_lea.hbm %s2705_s2, 8192 }
  0x1d   : > { %p2102_p12 = scmp.ne.s32.totalorder %s2705_s2, %s2101_s19  ;;  %p2108_p5 = scmp.lt.u32.totalorder %s2101_s19, %s2705_s2 }
  0x1f   : > { %p2104_p0 = pnand %p2443_p13, %p2102_p12 }
  0x21   : > { %p2105_p3 = pneg %p2104_p0 }
  0x23   : > { %p2110_p7 = pnand %p2108_p5, %p2105_p3 }
  0x25   : > { %2113 = shalt.err (!%p2110_p7)
}
  0x26   : > { %s2114_s10 = scalar_lea.vmem %s2420_s11, 8192  ;;  %p2122_p2 = scmp.lt.s32.totalorder %s2420_s11, %s2420_s11 }
  0x27   : > { %p2115_p9 = scmp.ne.s32.totalorder %s2420_s11, %s2114_s10  ;;  %p2123_p6 = scmp.lt.s32.totalorder %s2114_s10, %s2114_s10 }
  0x29   : > { %p2117_p10 = pnand %p2115_p9, %p2443_p13  ;;  %p2124_p12 = por %p2123_p6, %p2122_p2 }
  0x2b   : > { %p2118_p1 = pneg %p2117_p10 }
  0x2d   : > { %p2125_p0 = pnand %p2124_p12, %p2118_p1 }
  0x2f   : > { %2128 = shalt.err (!%p2125_p0)
}
  0x30   : > { %s2328_s13 = smov 256   ;;  %s2329_s15 = smov 16  }
  0x31   : > { %1857 = dma.hbm_to_vmem [thread:$0]  (!%p2427_p11), %s2705_s2, 8192, %s2420_s11, [#allocation6], %s2328_s13, %s2328_s13, %s2329_s15  }
  0x32   : > { %s2129_s21 = scalar_lea.hbm %s2688_s3, 4096 }
  0x33   : > { %p2130_p2 = scmp.ne.s32.totalorder %s2688_s3, %s2129_s21  ;;  %p2136_p10 = scmp.lt.u32.totalorder %s2129_s21, %s2688_s3 }
  0x35   : > { %p2132_p1 = pnand %p2130_p2, %p2443_p13 }
  0x37   : > { %p2133_p6 = pneg %p2132_p1 }
  0x39   : > { %p2138_p3 = pnand %p2136_p10, %p2133_p6 }
  0x3b   : > { %2141 = shalt.err (!%p2138_p3)
}
  0x3c   : > { %s2142_s11 = scalar_lea.vmem %s2431_s14, 4096  ;;  %p2150_p12 = scmp.lt.s32.totalorder %s2431_s14, %s2431_s14 }
  0x3d   : > { %p2143_p5 = scmp.ne.s32.totalorder %s2431_s14, %s2142_s11  ;;  %p2151_p0 = scmp.lt.s32.totalorder %s2142_s11, %s2142_s11 }
  0x3f   : > { %p2145_p7 = pnand %p2143_p5, %p2443_p13  ;;  %p2152_p2 = por %p2151_p0, %p2150_p12 }
  0x41   : > { %p2146_p9 = pneg %p2145_p7 }
  0x43   : > { %p2153_p1 = pnand %p2152_p2, %p2146_p9 }
  0x45   : > { %2156 = shalt.err (!%p2153_p1)
}
  0x46   : > { %1860 = dma.hbm_to_vmem [thread:$0]  (!%p2427_p11), %s2688_s3, 4096, %s2431_s14, [#allocation9], %s2328_s13, %s2328_s13, %s2329_s15  }
  0x47   : > { %s2157_s20 = scalar_lea.hbm %s2690_s5, 4096 }
  0x48   : > { %p2158_p6 = scmp.ne.s32.totalorder %s2690_s5, %s2157_s20  ;;  %p2164_p5 = scmp.lt.u32.totalorder %s2157_s20, %s2690_s5 }
  0x4a   : > { %p2160_p10 = pnand %p2158_p6, %p2443_p13 }
  0x4c   : > { %p2161_p3 = pneg %p2160_p10 }
  0x4e   : > { %p2166_p7 = pnand %p2164_p5, %p2161_p3 }
  0x50   : > { %2169 = shalt.err (!%p2166_p7)
}
  0x51   : > { %s2170_s11 = scalar_lea.vmem %s257_s16, 4096  ;;  %p2178_p2 = scmp.lt.s32.totalorder %s257_s16, %s257_s16 }
  0x52   : > { %p2171_p9 = scmp.ne.s32.totalorder %s257_s16, %s2170_s11  ;;  %p2179_p1 = scmp.lt.s32.totalorder %s2170_s11, %s2170_s11 }
  0x54   : > { %p2173_p12 = pnand %p2171_p9, %p2443_p13  ;;  %p2180_p4 = por %p2179_p1, %p2178_p2 }
  0x56   : > { %p2174_p0 = pneg %p2173_p12 }
  0x58   : > { %p2181_p8 = pnand %p2180_p4, %p2174_p0 }
  0x5a   : > { %2184 = shalt.err (!%p2181_p8)
}
  0x5b   : > { %s2330_s14 = smov 64   ;;  %s2331_s22 = smov 4  }
  0x5c   : > { %1863 = dma.hbm_to_vmem [thread:$0]  (!%p2427_p11), %s2690_s5, 4096, %s257_s16, [#allocation9], %s2330_s14, %s2330_s14, %s2331_s22  }
  0x5d   : > { %s2507_s8 = sadd.s32 1, %s2323_s27   ;;  %s34_s18 = sadd.s32 1, %s2319_s26 }
  0x5e   : > { %s31_s17 = ssub.s32 %s2323_s27, %s2507_s8  ;;  %p41_p8 = scmp.ne.s32.totalorder %s2319_s26, %s2315_s25 }
  0x5f   : > { %p32_p4 = scmp.eq.s32.totalorder %s31_s17, 0  ;;  %p42_p13 = scmp.eq.s32.totalorder %s2323_s27, 0 }
  0x60   : > { %p1878_p6 = scmp.lt.s32.totalorder %s2323_s27, 2  ;;  %p2707_p3 = scmp.eq.s32.totalorder %s2397_s28, 1 }
  0x61   : > { %s2517_s19 = scalar_select %p32_p4, %s2319_s26, %s34_s18  }
  0x62   : > { %p43_p10 = por %p42_p13, %p41_p8  ;;  %p2521_p5 = por %p2707_p3, %p41_p8 }
  0x63   : > { %s2526_s20 = sand.u32 1, %s2319_s26   ;;  %s1791_s16 = sshll.u32 %s2323_s27, 7 }
  0x64   : > { %s2708_s12 = scalar_select %p2521_p5, 1, 0 }
  0x65   : > { %s1644_s21 = sshll.u32 %s2526_s20, 3  ;;  %s2709_s0 = sld [smem:[#allocation18_spill]] }
  0x66   : > { %s277_s11 = scalar_lea.vmem [#allocation2], %s1644_s21  ;;  %p2535_p11 = pnand %p1878_p6, %p43_p10 }
  0x67   : > { %s285_s14 = sshll.u32 %s277_s11, 4  ;;  %s274_s15 = scalar_lea.sflag [#allocation3], %s2526_s20  ;;  %s2539_s14 = int_to_ptr.vmem [resolvable:$true] %s285_s14 }
  0x68   : > { %p2187_p9 = pneg %p2535_p11 }
  0x6b   : > { %s2533_s10 = scalar_lea.hbm %s2709_s0, %s1791_s16  ;;  %s2190_s21 = scalar_lea.hbm %s2709_s0, 256 }
  0x6c   : > { %s2185_s17 = scalar_lea.hbm %s2533_s10, 128  ;;  %p2191_p2 = scmp.lt.u32.totalorder %s2533_s10, %s2709_s0 }
  0x6d   : > { %p2186_p7 = scmp.ne.s32.totalorder %s2533_s10, %s2185_s17  ;;  %p2192_p1 = scmp.lt.u32.totalorder %s2190_s21, %s2185_s17 }
  0x6e   : > { %p2194_p8 = scmp.lt.u32.totalorder %s2185_s17, %s2533_s10 }
  0x6f   : > { %p2188_p12 = pnand %p2187_p9, %p2186_p7  ;;  %p2193_p4 = por %p2192_p1, %p2191_p2 }
  0x71   : > { %p2189_p0 = pneg %p2188_p12  ;;  %p2195_p13 = por %p2194_p8, %p2193_p4 }
  0x73   : > { %p2196_p6 = pnand %p2195_p13, %p2189_p0 }
  0x75   : > { %2199 = shalt.err (!%p2196_p6)
}
  0x76   : > { %s2200_s11 = scalar_lea.vmem %s2539_s14, 128  ;;  %s2332_s18 = smov [#allocation2]  }
  0x77   : > { %p2201_p10 = scmp.ne.s32.totalorder %s2539_s14, %s2200_s11  ;;  %s2205_s16 = sshll.u32 %s2332_s18, 4  ;;  %s2206_s16 = int_to_ptr.vmem [resolvable:$false] %s2205_s16 }
  0x78   : > { %s2207_s23 = scalar_lea.vmem %s2206_s16, 256  ;;  %p2208_p12 = scmp.lt.s32.totalorder %s2539_s14, %s2206_s16 }
  0x79   : > { %p2203_p3 = pnand %p2201_p10, %p2187_p9  ;;  %p2209_p2 = scmp.lt.s32.totalorder %s2207_s23, %s2200_s11 }
  0x7b   : > { %p2204_p7 = pneg %p2203_p3  ;;  %p2210_p1 = por %p2209_p2, %p2208_p12 }
  0x7d   : > { %p2211_p4 = pnand %p2210_p1, %p2204_p7 }
  0x7f   : > { %2214 = shalt.err (!%p2211_p4)
}
  0x80   : > { %1867 = dma.hbm_to_vmem [thread:$0]  (!%p2535_p11), %s2533_s10, 128, %s2539_s14, %s274_s15  }
  0x81   : > { %s1647_s17 = sshll.u32 %s2526_s20, 2  ;;  %s1648_s21 = sshll.u32 %s2323_s27, 6 }
  0x82   : > { %s2573_s13 = scalar_lea.hbm %s2686_s1, %s1648_s21  ;;  %s296_s11 = scalar_lea.vmem [#allocation5], %s1647_s17 }
  0x83   : > { %s303_s16 = sshll.u32 %s296_s11, 4  ;;  %s2711_s23 = sand.u32 1, %s2323_s27   ;;  %s304_s16 = int_to_ptr.vmem [resolvable:$true] %s303_s16 }
  0x84   : > { %s293_s0 = scalar_lea.sflag [#allocation6], %s2711_s23  ;;  %s2215_s2 = scalar_lea.hbm %s2573_s13, 64 }
  0x85   : > { %p2216_p0 = scmp.ne.s32.totalorder %s2573_s13, %s2215_s2  ;;  %s2220_s14 = scalar_lea.hbm %s2686_s1, 128 }
  0x86   : > { %p2221_p6 = scmp.lt.u32.totalorder %s2573_s13, %s2686_s1  ;;  %p2222_p10 = scmp.lt.u32.totalorder %s2220_s14, %s2215_s2 }
  0x87   : > { %p2218_p8 = pnand %p2216_p0, %p2187_p9  ;;  %p2224_p7 = scmp.lt.u32.totalorder %s2215_s2, %s2573_s13 }
  0x88   : > { %p2223_p3 = por %p2222_p10, %p2221_p6 }
  0x89   : > { %p2219_p13 = pneg %p2218_p8 }
  0x8a   : > { %p2225_p12 = por %p2224_p7, %p2223_p3 }
  0x8c   : > { %p2226_p2 = pnand %p2225_p12, %p2219_p13 }
  0x8e   : > { %2229 = shalt.err (!%p2226_p2)
}
  0x8f   : > { %s2230_s17 = scalar_lea.vmem %s304_s16, 64  ;;  %s2333_s29 = smov [#allocation5]  }
  0x90   : > { %p2231_p1 = scmp.ne.s32.totalorder %s304_s16, %s2230_s17  ;;  %s2235_s18 = sshll.u32 %s2333_s29, 4  ;;  %s2236_s18 = int_to_ptr.vmem [resolvable:$false] %s2235_s18 }
  0x91   : > { %s2237_s11 = scalar_lea.vmem %s2236_s18, 128  ;;  %p2238_p8 = scmp.lt.s32.totalorder %s304_s16, %s2236_s18 }
  0x92   : > { %p2233_p4 = pnand %p2231_p1, %p2187_p9  ;;  %p2239_p5 = scmp.lt.s32.totalorder %s2237_s11, %s2230_s17 }
  0x94   : > { %p2234_p0 = pneg %p2233_p4  ;;  %p2240_p6 = por %p2239_p5, %p2238_p8 }
  0x96   : > { %p2241_p10 = pnand %p2240_p6, %p2234_p0 }
  0x98   : > { %2244 = shalt.err (!%p2241_p10)
}
  0x99   : > { %1870 = dma.hbm_to_vmem [thread:$0]  (!%p2535_p11), %s2573_s13, 64, %s304_s16, %s293_s0  }
  0x9a   : > { %p2712_p13 = scmp.ne.s32.totalorder %s2703_s9, 0 }
  0x9b   : > { %s2599_s2 = sand.u32 (!%p2712_p13), 1, %s2315_s25   ;;  %p2713_p5 = scmp.ne.s32.totalorder (!%p2712_p13), %s2700_s30, 0 }
  0x9c   : > { %312 = sbr.rel (%p2712_p13) target bundleno = 727 (0x2d7), region = 48  ;;  %s1650_s23 = sshll.u32 (!%p2712_p13), %s2599_s2, 3 }
  0x9d   : > { %s315_s20 = scalar_lea.sflag (!%p2712_p13), [#allocation3], %s2599_s2  ;;  %s2605_s10 = scalar_lea.vmem (!%p2712_p13), [#allocation2], %s1650_s23 }
  0xa3   : > { %2290 = dma.done.wait (%p2713_p5), %s315_s20, 128  }
  0xa4   : > { %2292 = vsyncadd (%p2713_p5), %s315_s20, 4294967168  ;;  %s323_s0 = sand.u32 1, %s2397_s28   ;;  %s1651_s9 = sshll.u32 %s2599_s2, 2 }
  0xa5   : > { %s324_s22 = scalar_lea.sflag [#allocation6], %s323_s0  ;;  %s2613_s13 = scalar_lea.vmem [#allocation5], %s1651_s9 }
  0xa6   : > { %2294 = dma.done.wait (%p2713_p5), %s324_s22, 64  }
  0xa7   : > { %2296 = vsyncadd (%p2713_p5), %s324_s22, 4294967232  ;;  %p2714_p11 = scmp.eq.s32.totalorder %s2397_s28, 0 }
  0xa9   : > { %2298 = dma.done.wait (%p2714_p11), [#allocation6], 8192   ;;  %p2715_p9 = pmov %p2714_p11 }
  0xab   : > { %2300 = vsyncadd (%p2715_p9), [#allocation6], 4294959104  ;;  %p2716_p3 = pmov %p2715_p9 }
  0xad   : > { %2302 = dma.done.wait (%p2716_p3), [#allocation9], 8192   ;;  %p2717_p7 = pmov %p2716_p3 }
  0xae   : > { %v2334_v0 = vmov 0   ;;  %v1923_v1 = vld [vmem:[#allocation8 + $0x4] ss:$16 sps:$4 sm:$0xff]   ;;  %v1925_v2 = vld [vmem:[#allocation8 + $0xc] ss:$16 sps:$4 sm:$0xff]   ;;  %s1788_s21 = sshll.u32 %s2397_s28, 7 }
  0xaf   : > { %2304 = vsyncadd (%p2717_p7), [#allocation9], 4294959104  ;;  %666 = vmatprep.mubr.bf16.mxu0 %v2334_v0  ;;  %707 = vmatprep.mubr.bf16.mxu1 %v2334_v0  ;;  %v1927_v3 = vld [vmem:[#allocation8] ss:$16 sps:$4 sm:$0xff]   ;;  %v1928_v4 = vld [vmem:[#allocation8 + $0x8] ss:$16 sps:$4 sm:$0xff]   ;;  %s2641_s20 = scalar_lea.hbm %s2692_s7, %s1788_s21 }
  0xb0   : > { %634 = vmatprep.subr.bf16.mxu0 %v1923_v1  ;;  %675 = vmatprep.subr.bf16.mxu1 %v1925_v2  ;;  %v1929_v5 = vld [vmem:[#allocation8 + $0x24] ss:$16 sps:$4 sm:$0xff]   ;;  %v1931_v6 = vld [vmem:[#allocation8 + $0x2c] ss:$16 sps:$4 sm:$0xff]   ;;  %v1933_v7 = vld [vmem:[#allocation8 + $0x20] ss:$16 sps:$4 sm:$0xff]  }
  0xb1   : > { %635 = vmatpush1.bf16.msra.mxu0 %v1927_v3  ;;  %676 = vmatpush1.bf16.msra.mxu1 %v1928_v4  ;;  %v1934_v8 = vld [vmem:[#allocation8 + $0x28] ss:$16 sps:$4 sm:$0xff]   ;;  %v1935_v9 = vld [vmem:[#allocation8 + $0x44] ss:$16 sps:$4 sm:$0xff]   ;;  %v1937_v10 = vld [vmem:[#allocation8 + $0x4c] ss:$16 sps:$4 sm:$0xff]  }
  0xb2   : > { %636 = vmatprep.subr.bf16.mxu0 %v1929_v5  ;;  %677 = vmatprep.subr.bf16.mxu1 %v1931_v6  ;;  %v1939_v11 = vld [vmem:[#allocation8 + $0x40] ss:$16 sps:$4 sm:$0xff]   ;;  %v1940_v12 = vld [vmem:[#allocation8 + $0x48] ss:$16 sps:$4 sm:$0xff]   ;;  %v1941_v13 = vld [vmem:[#allocation8 + $0x64] ss:$16 sps:$4 sm:$0xff]  }
  0xb3   : > { %v1943_v14 = vld [vmem:[#allocation8 + $0x6c] ss:$16 sps:$4 sm:$0xff]   ;;  %v1945_v15 = vld [vmem:[#allocation8 + $0x60] ss:$16 sps:$4 sm:$0xff]   ;;  %v1946_v16 = vld [vmem:[#allocation8 + $0x68] ss:$16 sps:$4 sm:$0xff]  }
  0xb4   : > { %v1947_v17 = vld [vmem:[#allocation8 + $0x84] ss:$16 sps:$4 sm:$0xff]   ;;  %v1949_v18 = vld [vmem:[#allocation8 + $0x8c] ss:$16 sps:$4 sm:$0xff]   ;;  %v1951_v19 = vld [vmem:[#allocation8 + $0x80] ss:$16 sps:$4 sm:$0xff]  }
  0xb5   : > { %637 = vmatpush1.bf16.msra.mxu0 %v1933_v7  ;;  %678 = vmatpush1.bf16.msra.mxu1 %v1934_v8  ;;  %v1952_v20 = vld [vmem:[#allocation8 + $0x88] ss:$16 sps:$4 sm:$0xff]   ;;  %v1953_v21 = vld [vmem:[#allocation8 + $0xa4] ss:$16 sps:$4 sm:$0xff]   ;;  %v1955_v22 = vld [vmem:[#allocation8 + $0xac] ss:$16 sps:$4 sm:$0xff]  }
  0xb6   : > { %638 = vmatprep.subr.bf16.mxu0 %v1935_v9  ;;  %679 = vmatprep.subr.bf16.mxu1 %v1937_v10  ;;  %v1957_v23 = vld [vmem:[#allocation8 + $0xa0] ss:$16 sps:$4 sm:$0xff]   ;;  %v1958_v24 = vld [vmem:[#allocation8 + $0xa8] ss:$16 sps:$4 sm:$0xff]   ;;  %v1959_v25 = vld [vmem:[#allocation8 + $0xc4] ss:$16 sps:$4 sm:$0xff]  }
  0xb7   : > { %v1961_v26 = vld [vmem:[#allocation8 + $0xcc] ss:$16 sps:$4 sm:$0xff]   ;;  %v1963_v27 = vld [vmem:[#allocation8 + $0xc0] ss:$16 sps:$4 sm:$0xff]   ;;  %v1964_v28 = vld [vmem:[#allocation8 + $0xc8] ss:$16 sps:$4 sm:$0xff]  }
  0xb8   : > { %v1965_v29 = vld [vmem:[#allocation8 + $0xe4] ss:$16 sps:$4 sm:$0xff]   ;;  %v1967_v30 = vld [vmem:[#allocation8 + $0xec] ss:$16 sps:$4 sm:$0xff]   ;;  %v1969_v31 = vld [vmem:[#allocation8 + $0xe0] ss:$16 sps:$4 sm:$0xff]  }
  0xb9   : > { %639 = vmatpush1.bf16.msra.mxu0 %v1939_v11  ;;  %680 = vmatpush1.bf16.msra.mxu1 %v1940_v12  ;;  %v1970_v32 = vld [vmem:[#allocation8 + $0xe8] ss:$16 sps:$4 sm:$0xff]   ;;  %v1973_v33 = vld [vmem:[#allocation7 + $0x4] ss:$16 sps:$4 sm:$0xff]   ;;  %v1976_v34 = vld [vmem:[#allocation7 + $0xc] ss:$16 sps:$4 sm:$0xff]  }
  0xba   : > { %640 = vmatprep.subr.bf16.mxu0 %v1941_v13  ;;  %681 = vmatprep.subr.bf16.mxu1 %v1943_v14  ;;  %v441_v35 = vld [vmem:[%s2613_s13] sm:$0xf]  ;;  %v1971_v36 = vld [vmem:[#allocation7] ss:$16 sps:$4 sm:$0xff]   ;;  %v1979_v38 = vld [vmem:[#allocation7 + $0x24] ss:$16 sps:$4 sm:$0xff]  }
  0xbb   : > { %v1974_v37 = vld [vmem:[#allocation7 + $0x8] ss:$16 sps:$4 sm:$0xff]   ;;  %v1982_v39 = vld [vmem:[#allocation7 + $0x2c] ss:$16 sps:$4 sm:$0xff]   ;;  %v1977_v40 = vld [vmem:[#allocation7 + $0x20] ss:$16 sps:$4 sm:$0xff]  }
  0xbc   : > { %v1980_v41 = vld [vmem:[#allocation7 + $0x28] ss:$16 sps:$4 sm:$0xff]   ;;  %v1985_v42 = vld [vmem:[#allocation7 + $0x44] ss:$16 sps:$4 sm:$0xff]   ;;  %v1988_v43 = vld [vmem:[#allocation7 + $0x4c] ss:$16 sps:$4 sm:$0xff]  }
  0xbd   : > { %641 = vmatpush1.bf16.msra.mxu0 %v1945_v15  ;;  %682 = vmatpush1.bf16.msra.mxu1 %v1946_v16  ;;  %v1983_v44 = vld [vmem:[#allocation7 + $0x40] ss:$16 sps:$4 sm:$0xff]   ;;  %v1986_v45 = vld [vmem:[#allocation7 + $0x48] ss:$16 sps:$4 sm:$0xff]   ;;  %v1991_v46 = vld [vmem:[#allocation7 + $0x64] ss:$16 sps:$4 sm:$0xff]  }
  0xbe   : > { %642 = vmatprep.subr.bf16.mxu0 %v1947_v17  ;;  %683 = vmatprep.subr.bf16.mxu1 %v1949_v18  ;;  %v1994_v47 = vld [vmem:[#allocation7 + $0x6c] ss:$16 sps:$4 sm:$0xff]   ;;  %v1989_v48 = vld [vmem:[#allocation7 + $0x60] ss:$16 sps:$4 sm:$0xff]   ;;  %v1992_v49 = vld [vmem:[#allocation7 + $0x68] ss:$16 sps:$4 sm:$0xff]  }
  0xbf   : > { %v1997_v50 = vld [vmem:[#allocation7 + $0x84] ss:$16 sps:$4 sm:$0xff]   ;;  %v2000_v51 = vld [vmem:[#allocation7 + $0x8c] ss:$16 sps:$4 sm:$0xff]   ;;  %v1995_v52 = vld [vmem:[#allocation7 + $0x80] ss:$16 sps:$4 sm:$0xff]  }
  0xc0   : > { %v1998_v53 = vld [vmem:[#allocation7 + $0x88] ss:$16 sps:$4 sm:$0xff]   ;;  %v2003_v54 = vld [vmem:[#allocation7 + $0xa4] ss:$16 sps:$4 sm:$0xff]   ;;  %v2006_v55 = vld [vmem:[#allocation7 + $0xac] ss:$16 sps:$4 sm:$0xff]  }
  0xc1   : > { %643 = vmatpush1.bf16.msra.mxu0 %v1951_v19  ;;  %684 = vmatpush1.bf16.msra.mxu1 %v1952_v20  ;;  %v2001_v56 = vld [vmem:[#allocation7 + $0xa0] ss:$16 sps:$4 sm:$0xff]   ;;  %v2004_v57 = vld [vmem:[#allocation7 + $0xa8] ss:$16 sps:$4 sm:$0xff]   ;;  %v2009_v58 = vld [vmem:[#allocation7 + $0xc4] ss:$16 sps:$4 sm:$0xff]  }
  0xc2   : > { %644 = vmatprep.subr.bf16.mxu0 %v1953_v21  ;;  %685 = vmatprep.subr.bf16.mxu1 %v1955_v22  ;;  %v2012_v59 = vld [vmem:[#allocation7 + $0xcc] ss:$16 sps:$4 sm:$0xff]   ;;  %v2007_v60 = vld [vmem:[#allocation7 + $0xc0] ss:$16 sps:$4 sm:$0xff]   ;;  %v2010_v61 = vld [vmem:[#allocation7 + $0xc8] ss:$16 sps:$4 sm:$0xff]  }
  0xc3   : > { %v2015_v62 = vld [vmem:[#allocation7 + $0xe4] ss:$16 sps:$4 sm:$0xff]   ;;  %v2018_v63 = vld [vmem:[#allocation7 + $0xec] ss:$16 sps:$4 sm:$0xff]   ;;  %v2013_v0 = vld [vmem:[#allocation7 + $0xe0] ss:$16 sps:$4 sm:$0xff]  }
  0xc4   : > { %v2016_v1 = vld [vmem:[#allocation7 + $0xe8] ss:$16 sps:$4 sm:$0xff]   ;;  %v2021_v2 = vld [vmem:[#allocation7 + $0x104] ss:$16 sps:$4 sm:$0xff]   ;;  %v2024_v3 = vld [vmem:[#allocation7 + $0x10c] ss:$16 sps:$4 sm:$0xff]  }
  0xc5   : > { %645 = vmatpush1.bf16.msra.mxu0 %v1957_v23  ;;  %686 = vmatpush1.bf16.msra.mxu1 %v1958_v24  ;;  %v2019_v4 = vld [vmem:[#allocation7 + $0x100] ss:$16 sps:$4 sm:$0xff]   ;;  %v2022_v5 = vld [vmem:[#allocation7 + $0x108] ss:$16 sps:$4 sm:$0xff]   ;;  %v2027_v6 = vld [vmem:[#allocation7 + $0x124] ss:$16 sps:$4 sm:$0xff]  }
  0xc6   : > { %646 = vmatprep.subr.bf16.mxu0 %v1959_v25  ;;  %687 = vmatprep.subr.bf16.mxu1 %v1961_v26  ;;  %v2030_v7 = vld [vmem:[#allocation7 + $0x12c] ss:$16 sps:$4 sm:$0xff]   ;;  %v2025_v10 = vld [vmem:[#allocation7 + $0x120] ss:$16 sps:$4 sm:$0xff]   ;;  %v2028_v11 = vld [vmem:[#allocation7 + $0x128] ss:$16 sps:$4 sm:$0xff]  }
  0xc7   : > { %v376_v8 = vld [vmem:[%s2605_s10] sm:$0xff]  ;;  %s374_s17 = scalar_lea.vmem [#allocation11], %s1650_s23  ;;  %s1504_s10 = scalar_lea.sflag [#allocation4], %s2599_s2 }
  0xc8   : > { %v1689_v9 = vcombine.high %v376_v8, %v376_v8  ;;  %v2033_v12 = vld [vmem:[#allocation7 + $0x144] ss:$16 sps:$4 sm:$0xff]   ;;  %v2036_v13 = vld [vmem:[#allocation7 + $0x14c] ss:$16 sps:$4 sm:$0xff]   ;;  %v2031_v14 = vld [vmem:[#allocation7 + $0x140] ss:$16 sps:$4 sm:$0xff]  }
  0xc9   : > { %647 = vmatpush1.bf16.msra.mxu0 %v1963_v27  ;;  %688 = vmatpush1.bf16.msra.mxu1 %v1964_v28  ;;  %v2034_v15 = vld [vmem:[#allocation7 + $0x148] ss:$16 sps:$4 sm:$0xff]   ;;  %v2039_v16 = vld [vmem:[#allocation7 + $0x164] ss:$16 sps:$4 sm:$0xff]   ;;  %v2042_v17 = vld [vmem:[#allocation7 + $0x16c] ss:$16 sps:$4 sm:$0xff]  }
  0xca   : > { %648 = vmatprep.subr.bf16.mxu0 %v1965_v29  ;;  %689 = vmatprep.subr.bf16.mxu1 %v1967_v30  ;;  %v2037_v18 = vld [vmem:[#allocation7 + $0x160] ss:$16 sps:$4 sm:$0xff]   ;;  %v2040_v19 = vld [vmem:[#allocation7 + $0x168] ss:$16 sps:$4 sm:$0xff]   ;;  %v2045_v20 = vld [vmem:[#allocation7 + $0x184] ss:$16 sps:$4 sm:$0xff]  }
  0xcb   : > { %v2048_v21 = vld [vmem:[#allocation7 + $0x18c] ss:$16 sps:$4 sm:$0xff]   ;;  %v2043_v22 = vld [vmem:[#allocation7 + $0x180] ss:$16 sps:$4 sm:$0xff]   ;;  %v2046_v23 = vld [vmem:[#allocation7 + $0x188] ss:$16 sps:$4 sm:$0xff]  }
  0xcc   : > { %v2051_v24 = vld [vmem:[#allocation7 + $0x1a4] ss:$16 sps:$4 sm:$0xff]   ;;  %v2054_v25 = vld [vmem:[#allocation7 + $0x1ac] ss:$16 sps:$4 sm:$0xff]   ;;  %v2049_v26 = vld [vmem:[#allocation7 + $0x1a0] ss:$16 sps:$4 sm:$0xff]  }
  0xcd   : > { %649 = vmatpush1.bf16.msra.mxu0 %v1969_v31  ;;  %690 = vmatpush1.bf16.msra.mxu1 %v1970_v32  ;;  %v2052_v27 = vld [vmem:[#allocation7 + $0x1a8] ss:$16 sps:$4 sm:$0xff]   ;;  %v2057_v28 = vld [vmem:[#allocation7 + $0x1c4] ss:$16 sps:$4 sm:$0xff]   ;;  %v2060_v29 = vld [vmem:[#allocation7 + $0x1cc] ss:$16 sps:$4 sm:$0xff]  }
  0xce   : > { %1043 = vmatprep.subr.bf16.mxu0 %v1973_v33  ;;  %1084 = vmatprep.subr.bf16.mxu1 %v1976_v34  ;;  %v2055_v30 = vld [vmem:[#allocation7 + $0x1c0] ss:$16 sps:$4 sm:$0xff]   ;;  %v2058_v31 = vld [vmem:[#allocation7 + $0x1c8] ss:$16 sps:$4 sm:$0xff]   ;;  %v2063_v32 = vld [vmem:[#allocation7 + $0x1e4] ss:$16 sps:$4 sm:$0xff]  }
  0xcf   : > { %v2066_v33 = vld [vmem:[#allocation7 + $0x1ec] ss:$16 sps:$4 sm:$0xff]   ;;  %v2061_v34 = vld [vmem:[#allocation7 + $0x1e0] ss:$16 sps:$4 sm:$0xff]   ;;  %s1517_s29 = sshll.u32 %s374_s17, 4  ;;  %p2718_p2 = scmp.ne.s32.totalorder %s2708_s12, 0  ;;  %s2643_s29 = int_to_ptr.vmem [resolvable:$true] %s1517_s29 }
  0xd0   : > { %667 = vmatmul.mubr.bf16.vlgmr.msra.gmra.mrb[0].mxu0 %v441_v35  ;;  %708 = vmatmul.mubr.bf16.vlgmr.msra.gmra.mrb[0].mxu1 %v441_v35  ;;  %v2064_v35 = vld [vmem:[#allocation7 + $0x1e8] ss:$16 sps:$4 sm:$0xff]   ;;  %s2245_s0 = scalar_lea.vmem %s2643_s29, 128  ;;  %s2335_s28 = smov [#allocation11]  }
  0xd1   : > { %1044 = vmatpush1.bf16.msra.mxu0 %v1971_v36  ;;  %1085 = vmatpush1.bf16.msra.mxu1 %v1974_v37  ;;  %v1688_v36 = vcombine.low %v376_v8, %v376_v8  ;;  %v2069_v37 = vld [vmem:[#allocation10 + $0x40] sm:$0xff]   ;;  %p2246_p12 = scmp.ne.s32.totalorder %s2643_s29, %s2245_s0  ;;  %s2249_s23 = sshll.u32 %s2335_s28, 4  ;;  %s2250_s23 = int_to_ptr.vmem [resolvable:$false] %s2249_s23 }
  0xd2   : > { %1045 = vmatprep.subr.bf16.mxu0 %v1979_v38  ;;  %1086 = vmatprep.subr.bf16.mxu1 %v1982_v39  ;;  %v2070_v38 = vld [vmem:[#allocation10 + $0xc0] sm:$0xff]   ;;  %s2251_s9 = scalar_lea.vmem %s2250_s23, 256  ;;  %p2252_p0 = scmp.lt.s32.totalorder %s2643_s29, %s2250_s23 }
  0xd3   : > { %1075 = vmatprep.mubr.bf16.mxu0 %v1689_v9  ;;  %1116 = vmatprep.mubr.bf16.mxu1 %v1689_v9  ;;  %v2071_v39 = vld [vmem:[#allocation10] sm:$0xff]   ;;  %p2247_p1 = pnand %p2246_p12, %p2718_p2  ;;  %p2253_p8 = scmp.lt.s32.totalorder %s2251_s9, %s2245_s0 }
  0xd5   : > { %1046 = vmatpush1.bf16.msra.mxu0 %v1977_v40  ;;  %1087 = vmatpush1.bf16.msra.mxu1 %v1980_v41  ;;  %v2072_v40 = vld [vmem:[#allocation10 + $0x80] sm:$0xff]   ;;  %v2073_v41 = vld [vmem:[#allocation10 + $0x48] sm:$0xff]   ;;  %p2248_p4 = pneg %p2247_p1  ;;  %p2254_p6 = por %p2253_p8, %p2252_p0 }
  0xd6   : > { %1047 = vmatprep.subr.bf16.mxu0 %v1985_v42  ;;  %1088 = vmatprep.subr.bf16.mxu1 %v1988_v43  ;;  %v2074_v42 = vld [vmem:[#allocation10 + $0xc8] sm:$0xff]  }
  0xd7   : > { %v2075_v43 = vld [vmem:[#allocation10 + $0x8] sm:$0xff]   ;;  %p2255_p10 = pnand %p2254_p6, %p2248_p4 }
  0xd9   : > { %1048 = vmatpush1.bf16.msra.mxu0 %v1983_v44  ;;  %1089 = vmatpush1.bf16.msra.mxu1 %v1986_v45  ;;  %v2076_v44 = vld [vmem:[#allocation10 + $0x88] sm:$0xff]   ;;  %v2077_v45 = vld [vmem:[#allocation10 + $0x50] sm:$0xff]  }
  0xda   : > { %1049 = vmatprep.subr.bf16.mxu0 %v1991_v46  ;;  %1090 = vmatprep.subr.bf16.mxu1 %v1994_v47  ;;  %v2078_v46 = vld [vmem:[#allocation10 + $0xd0] sm:$0xff]  }
  0xdb   : > { %v2079_v47 = vld [vmem:[#allocation10 + $0x10] sm:$0xff]  }
  0xdd   : > { %1050 = vmatpush1.bf16.msra.mxu0 %v1989_v48  ;;  %1091 = vmatpush1.bf16.msra.mxu1 %v1992_v49  ;;  %v2080_v48 = vld [vmem:[#allocation10 + $0x90] sm:$0xff]   ;;  %v2081_v49 = vld [vmem:[#allocation10 + $0x58] sm:$0xff]  }
  0xde   : > { %1051 = vmatprep.subr.bf16.mxu0 %v1997_v50  ;;  %1092 = vmatprep.subr.bf16.mxu1 %v2000_v51  ;;  %v2082_v50 = vld [vmem:[#allocation10 + $0xd8] sm:$0xff]  }
  0xdf   : > { %v2083_v51 = vld [vmem:[#allocation10 + $0x18] sm:$0xff]  }
  0xe1   : > { %1052 = vmatpush1.bf16.msra.mxu0 %v1995_v52  ;;  %1093 = vmatpush1.bf16.msra.mxu1 %v1998_v53  ;;  %v2084_v52 = vld [vmem:[#allocation10 + $0x98] sm:$0xff]   ;;  %v2085_v53 = vld [vmem:[#allocation10 + $0x60] sm:$0xff]  }
  0xe2   : > { %1053 = vmatprep.subr.bf16.mxu0 %v2003_v54  ;;  %1094 = vmatprep.subr.bf16.mxu1 %v2006_v55  ;;  %v2086_v54 = vld [vmem:[#allocation10 + $0xe0] sm:$0xff]  }
  0xe3   : > { %v2087_v55 = vld [vmem:[#allocation10 + $0x20] sm:$0xff]  }
  0xe5   : > { %1054 = vmatpush1.bf16.msra.mxu0 %v2001_v56  ;;  %1095 = vmatpush1.bf16.msra.mxu1 %v2004_v57  ;;  %v2088_v56 = vld [vmem:[#allocation10 + $0xa0] sm:$0xff]   ;;  %v2089_v57 = vld [vmem:[#allocation10 + $0x68] sm:$0xff]  }
  0xe6   : > { %1055 = vmatprep.subr.bf16.mxu0 %v2009_v58  ;;  %1096 = vmatprep.subr.bf16.mxu1 %v2012_v59  ;;  %v2090_v58 = vld [vmem:[#allocation10 + $0xe8] sm:$0xff]  }
  0xe7   : > { %v2091_v59 = vld [vmem:[#allocation10 + $0x28] sm:$0xff]  }
  0xe9   : > { %1056 = vmatpush1.bf16.msra.mxu0 %v2007_v60  ;;  %1097 = vmatpush1.bf16.msra.mxu1 %v2010_v61  ;;  %v2092_v60 = vld [vmem:[#allocation10 + $0xa8] sm:$0xff]   ;;  %v2093_v61 = vld [vmem:[#allocation10 + $0x70] sm:$0xff]  }
  0xea   : > { %1057 = vmatprep.subr.bf16.mxu0 %v2015_v62  ;;  %1098 = vmatprep.subr.bf16.mxu1 %v2018_v63  ;;  %v2094_v62 = vld [vmem:[#allocation10 + $0xf0] sm:$0xff]  }
  0xeb   : > { %v2095_v63 = vld [vmem:[#allocation10 + $0x30] sm:$0xff]  }
  0xed   : > { %1058 = vmatpush1.bf16.msra.mxu0 %v2013_v0  ;;  %1099 = vmatpush1.bf16.msra.mxu1 %v2016_v1  ;;  %v2096_v0 = vld [vmem:[#allocation10 + $0xb0] sm:$0xff]   ;;  %v2097_v1 = vld [vmem:[#allocation10 + $0x78] sm:$0xff]  }
  0xee   : > { %1059 = vmatprep.subr.bf16.mxu0 %v2021_v2  ;;  %1100 = vmatprep.subr.bf16.mxu1 %v2024_v3  ;;  %v2098_v2 = vld [vmem:[#allocation10 + $0xf8] sm:$0xff]  }
  0xef   : > { %v2099_v3 = vld [vmem:[#allocation10 + $0x38] sm:$0xff]  }
  0xf1   : > { %1060 = vmatpush1.bf16.msra.mxu0 %v2019_v4  ;;  %1101 = vmatpush1.bf16.msra.mxu1 %v2022_v5  ;;  %v2100_v4 = vld [vmem:[#allocation10 + $0xb8] sm:$0xff]  }
  0xf2   : > { %1061 = vmatprep.subr.bf16.mxu0 %v2027_v6  ;;  %1102 = vmatprep.subr.bf16.mxu1 %v2030_v7 }
  0xf5   : > { %1062 = vmatpush1.bf16.msra.mxu0 %v2025_v10  ;;  %1103 = vmatpush1.bf16.msra.mxu1 %v2028_v11 }
  0xf6   : > { %1063 = vmatprep.subr.bf16.mxu0 %v2033_v12  ;;  %1104 = vmatprep.subr.bf16.mxu1 %v2036_v13  ;;  %v1127_v13 = vlaneseq }
  0xf9   : > { %1064 = vmatpush1.bf16.msra.mxu0 %v2031_v14  ;;  %1105 = vmatpush1.bf16.msra.mxu1 %v2034_v15  ;;  %v1128_v14 = vshrl.u32 %v1127_v13, 7 }
  0xfa   : > { %1065 = vmatprep.subr.bf16.mxu0 %v2039_v16  ;;  %1106 = vmatprep.subr.bf16.mxu1 %v2042_v17  ;;  %v1125_v17 = vld [vmem:[%s2689_s4] sm:$0xf] }
  0xfb   : > { %v1129_v15 = vsub.s32 0, %v1128_v14  ;;  %v1137_v16 = vsub.s32 2, %v1128_v14 }
  0xfd   : > { %1066 = vmatpush1.bf16.msra.mxu0 %v2037_v18  ;;  %1107 = vmatpush1.bf16.msra.mxu1 %v2040_v19  ;;  %v1133_v18 = vsub.s32 1, %v1128_v14  ;;  %v1141_v19 = vsub.s32 3, %v1128_v14 }
  0xfe   : > { %1067 = vmatprep.subr.bf16.mxu0 %v2045_v20  ;;  %1108 = vmatprep.subr.bf16.mxu1 %v2048_v21  ;;  %v1130_v20 = vrot.slane %v1125_v17, %v1129_v15  ;;  %v1138_v21 = vrot.slane %v1125_v17, %v1137_v16 }
 0x101   : > { %1068 = vmatpush1.bf16.msra.mxu0 %v2043_v22  ;;  %1109 = vmatpush1.bf16.msra.mxu1 %v2046_v23 }
 0x102   : > { %1069 = vmatprep.subr.bf16.mxu0 %v2051_v24  ;;  %1110 = vmatprep.subr.bf16.mxu1 %v2054_v25  ;;  %v1134_v24 = vrot.slane %v1125_v17, %v1133_v18  ;;  %v1142_v25 = vrot.slane %v1125_v17, %v1141_v19 }
 0x105   : > { %1070 = vmatpush1.bf16.msra.mxu0 %v2049_v26  ;;  %1111 = vmatpush1.bf16.msra.mxu1 %v2052_v27 }
 0x106   : > { %1071 = vmatprep.subr.bf16.mxu0 %v2057_v28  ;;  %1112 = vmatprep.subr.bf16.mxu1 %v2060_v29 }
 0x109   : > { %1072 = vmatpush1.bf16.msra.mxu0 %v2055_v30  ;;  %1113 = vmatpush1.bf16.msra.mxu1 %v2058_v31 }
 0x10a   : > { %1073 = vmatprep.subr.bf16.mxu0 %v2063_v32  ;;  %1114 = vmatprep.subr.bf16.mxu1 %v2066_v33 }
 0x10d   : > { %1074 = vmatpush1.bf16.msra.mxu0 %v2061_v34  ;;  %1115 = vmatpush1.bf16.msra.mxu1 %v2064_v35 }
 0x10e   : > { %1792 = vmatprep.subr.bf16.mxu0 %v2069_v37  ;;  %1814 = vmatprep.subr.bf16.mxu1 %v2070_v38 }
 0x110   : > { %1076 = vmatmul.mubr.bf16.vlgmr.msra.gmra.mrb[4].mxu0 %v1688_v36  ;;  %1117 = vmatmul.mubr.bf16.vlgmr.msra.gmra.mrb[4].mxu1 %v1688_v36 }
 0x111   : > { %1793 = vmatpush3.bf16.msra.mxu0 %v2071_v39  ;;  %1815 = vmatpush3.bf16.msra.mxu1 %v2072_v40 }
 0x112   : > { %1794 = vmatprep.subr.bf16.mxu0 %v2073_v41  ;;  %1816 = vmatprep.subr.bf16.mxu1 %v2074_v42 }
 0x115   : > { %1795 = vmatpush3.bf16.msra.mxu0 %v2075_v43  ;;  %1817 = vmatpush3.bf16.msra.mxu1 %v2076_v44 }
 0x116   : > { %1796 = vmatprep.subr.bf16.mxu0 %v2077_v45  ;;  %1818 = vmatprep.subr.bf16.mxu1 %v2078_v46 }
 0x119   : > { %1797 = vmatpush3.bf16.msra.mxu0 %v2079_v47  ;;  %1819 = vmatpush3.bf16.msra.mxu1 %v2080_v48 }
 0x11a   : > { %1798 = vmatprep.subr.bf16.mxu0 %v2081_v49  ;;  %1820 = vmatprep.subr.bf16.mxu1 %v2082_v50  ;;  %v1754_v50 = vld [vmem:[%s2691_s6] ss:$0 sm:$0xff] }
 0x11d   : > { %1799 = vmatpush3.bf16.msra.mxu0 %v2083_v51  ;;  %1821 = vmatpush3.bf16.msra.mxu1 %v2084_v52 }
 0x11e   : > { %1800 = vmatprep.subr.bf16.mxu0 %v2085_v53  ;;  %1822 = vmatprep.subr.bf16.mxu1 %v2086_v54 }
 0x121   : > { %1801 = vmatpush3.bf16.msra.mxu0 %v2087_v55  ;;  %1823 = vmatpush3.bf16.msra.mxu1 %v2088_v56 }
 0x122   : > { %1802 = vmatprep.subr.bf16.mxu0 %v2089_v57  ;;  %1824 = vmatprep.subr.bf16.mxu1 %v2090_v58 }
 0x125   : > { %1803 = vmatpush3.bf16.msra.mxu0 %v2091_v59  ;;  %1825 = vmatpush3.bf16.msra.mxu1 %v2092_v60 }
 0x126   : > { %1804 = vmatprep.subr.bf16.mxu0 %v2093_v61  ;;  %1826 = vmatprep.subr.bf16.mxu1 %v2094_v62 }
 0x129   : > { %1805 = vmatpush3.bf16.msra.mxu0 %v2095_v63  ;;  %1827 = vmatpush3.bf16.msra.mxu1 %v2096_v0 }
 0x12a   : > { %1806 = vmatprep.subr.bf16.mxu0 %v2097_v1  ;;  %1828 = vmatprep.subr.bf16.mxu1 %v2098_v2 }
 0x12d   : > { %1807 = vmatpush3.bf16.msra.mxu0 %v2099_v3  ;;  %1829 = vmatpush3.bf16.msra.mxu1 %v2100_v4 }
 0x1a3   : > { %v668_v5 = vpop.f32.mrb[0].mxu0  ;;  %v709_v6 = vpop.f32.mrb[0].mxu1 }
 0x1a4   : > { %v670_v7 = vpop.f32.mrb[1].mxu0  ;;  %v711_v8 = vpop.f32.mrb[1].mxu1 }
 0x1a5   : > { %v672_v9 = vpop.f32.mrb[2].mxu0  ;;  %v713_v10 = vpop.f32.mrb[2].mxu1 }
 0x1a6   : > { %v673_v11 = vpop.f32.mrb[3].mxu0  ;;  %v714_v12 = vpop.f32.mrb[3].mxu1 }
 0x1e3   : > { %v1077_v22 = vpop.f32.mrb[4].mxu0  ;;  %v1118_v23 = vpop.f32.mrb[4].mxu1 }
 0x1e4   : > { %v1078_v26 = vadd.f32 %v1077_v22, %v668_v5  ;;  %v1119_v27 = vadd.f32 %v1118_v23, %v709_v6  ;;  %v1079_v28 = vpop.f32.mrb[5].mxu0  ;;  %v1120_v29 = vpop.f32.mrb[5].mxu1 }
 0x1e5   : > { %v1080_v30 = vadd.f32 %v1079_v28, %v670_v7  ;;  %v1121_v31 = vadd.f32 %v1120_v29, %v711_v8  ;;  %v1081_v32 = vpop.f32.mrb[6].mxu0  ;;  %v1122_v33 = vpop.f32.mrb[6].mxu1 }
 0x1e6   : > { %v1147_v34 = vadd.f32 %v1130_v20, %v1078_v26  ;;  %v1149_v35 = vadd.f32 %v1138_v21, %v1119_v27  ;;  %v1082_v36 = vpop.f32.mrb[7].mxu0  ;;  %v1123_v37 = vpop.f32.mrb[7].mxu1 }
 0x1e7   : > { %v1148_v38 = vadd.f32 %v1134_v24, %v1080_v30  ;;  %v1150_v39 = vadd.f32 %v1142_v25, %v1121_v31 }
 0x1e8   : > { %v1151_v40 = vmax.f32 %v1147_v34, 0.0  ;;  %v1153_v41 = vmax.f32 %v1149_v35, 0.0 }
 0x1e9   : > { %v1152_v42 = vmax.f32 %v1148_v38, 0.0  ;;  %v1154_v43 = vmax.f32 %v1150_v39, 0.0 }
 0x1ea   : > { %v1155_v46 = vpack.c.bf16 %v1151_v40, %v1151_v40  ;;  %v1157_v47 = vpack.c.bf16 %v1153_v41, %v1153_v41 }
 0x1eb   : > { %v1156_v44 = vpack.c.bf16 %v1152_v42, %v1152_v42  ;;  %v1158_v45 = vpack.c.bf16 %v1154_v43, %v1154_v43 }
 0x1ed   : > { %1454 = vmatprep.mubr.bf16.mxu0 %v1156_v44  ;;  %1494 = vmatprep.mubr.bf16.mxu1 %v1158_v45 }
 0x1ee   : > { %1455 = vmatmul.mubr.bf16.vlgmr.msra.gmra.mrb[8].mxu0 %v1155_v46  ;;  %1495 = vmatmul.mubr.bf16.vlgmr.msra.gmra.mrb[8].mxu1 %v1157_v47 }
 0x2c1   : > { %v1808_v48 = vpop.f32.mrb[8].mxu0  ;;  %v1830_v49 = vpop.f32.mrb[8].mxu1 }
 0x2c2   : > { %v1809_v51 = vpop.f32.mrb[9].mxu0  ;;  %v1831_v52 = vpop.f32.mrb[9].mxu1 }
 0x2c3   : > { %v1810_v53 = vadd.f32 %v1809_v51, %v1808_v48  ;;  %v1832_v54 = vadd.f32 %v1831_v52, %v1830_v49  ;;  %v1811_v55 = vpop.f32.mrb[10].mxu0  ;;  %v1833_v56 = vpop.f32.mrb[10].mxu1 }
 0x2c4   : > { %v1812_v57 = vpop.f32.mrb[11].mxu0  ;;  %v1834_v58 = vpop.f32.mrb[11].mxu1 }
 0x2c5   : > { %v1457_v59 = vadd.f32 %v1810_v53, %v1754_v50 }
 0x2c7   : > { %v1497_v60 = vadd.f32 %v1832_v54, %v1457_v59 }
 0x2c9   : > { %1502 = vst [vmem:[%s374_s17] sm:$0xff] %v1497_v60 }
 0x2ca   : > { %2258 = shalt.err (!%p2255_p10)
}
 0x2cb   : > { %s2259_s2 = scalar_lea.hbm %s2641_s20, 128  ;;  %s2263_s30 = scalar_lea.hbm %s2692_s7, 256 }
 0x2cc   : > { %p2260_p13 = scmp.ne.s32.totalorder %s2641_s20, %s2259_s2  ;;  %p2264_p9 = scmp.lt.u32.totalorder %s2641_s20, %s2692_s7 }
 0x2cd   : > { %p2265_p3 = scmp.lt.u32.totalorder %s2263_s30, %s2259_s2  ;;  %p2267_p12 = scmp.lt.u32.totalorder %s2259_s2, %s2641_s20 }
 0x2ce   : > { %p2261_p5 = pnand %p2260_p13, %p2718_p2 }
 0x2cf   : > { %p2266_p7 = por %p2265_p3, %p2264_p9 }
 0x2d0   : > { %p2262_p11 = pneg %p2261_p5 }
 0x2d1   : > { %p2268_p1 = por %p2267_p12, %p2266_p7 }
 0x2d3   : > { %p2269_p4 = pnand %p2268_p1, %p2262_p11 }
 0x2d5   : > { %2272 = shalt.err (!%p2269_p4)
}
 0x2d6   : > { %1852 = dma.vmem_to_hbm [thread:$0]  (%p2718_p2), %s2643_s29, 128, %s2641_s20, %s1504_s10  }
 0x2d7 PF: > { %s2719_s15 = sld [smem:[#allocation17_spill]]  ;;  %s1529_s21 = sand.u32 1, %s2311_s24  }
 0x2d8   : > { %p2721_p8 = scmp.ge.s32.totalorder %s2323_s27, 2  ;;  %s1530_s17 = scalar_lea.sflag [#allocation4], %s1529_s21 }
 0x2dd   : > { %p2720_p0 = scmp.ne.s32.totalorder %s2719_s15, 0 }
 0x2df   : > { %p1872_p6 = pnand %p2721_p8, %p2720_p0 }
 0x2e1   : > { %2306 = dma.done.wait (!%p1872_p6), %s1530_s17, 128  }
 0x2e2   : > { %2308 = vsyncadd (!%p1872_p6), %s1530_s17, 4294967168  ;;  %p24_p10 = scmp.ge.s32.totalorder %s2507_s8, 4   ;;  %s2722_s24 = smov %s2315_s25 }
 0x2e3   : > { %s2723_s25 = smov %s2319_s26  ;;  %s2724_s26 = smov %s2517_s19 }
 0x2e4   : > { %s2725_s27 = smov %s2507_s8  ;;  %26 = sbr.rel (!%p24_p10) target bundleno = 11 (0xb), region = 118 }
 0x2eb   :  { %1535 = vsyncpa [#allocation3], 1 }
 0x2ec   :  { %1537 = vsyncpa [#allocation3 + $0x1], 1 }
 0x2ed   :  { %1538 = vsyncpa [#allocation6], 1 }
 0x2ee   :  { %1540 = vsyncpa [#allocation6 + $0x1], 1 }
 0x2ef   :  { %1541 = vsyncpa [#allocation9], 1 }
 0x2f0   :  { %1542 = vsyncpa [#allocation4], 1 }
 0x2f1   :  { %1544 = vsyncpa [#allocation4 + $0x1], 1 }

</bundles_post_ra>
